<compile_context>
chip_gen: v6e
topology: v6e:2x2x1
jax: 0.10.0
libtpu: 0.0.40
codegen_flags: <defaults>
</compile_context>

<pallas_src>
import functools

import jax
import jax.numpy as jnp
from jax.experimental import pallas as pl
from jax.experimental.pallas import tpu as pltpu


# ----------------------------------------------------------------------------
# Plain-JAX glue: three_nn + inverse-distance interpolation.
# Data-dependent nearest-neighbor gather -- kept outside the Pallas kernel.
# TODO(synk): fuse the three_interpolate gather into the kernel via scalar
#             prefetch (SMEM idx table + DMA gather) to avoid materializing the
#             interpolated feature tensor in HBM at large n.
# ----------------------------------------------------------------------------
def three_nn(unknown, known):
    """unknown: (B, n, 3), known: (B, m, 3) -> (dist (B,n,3), idx (B,n,3)).
    dist is euclidean distance (matches ThreeNN returning sqrt(dist2))."""
    d2 = jnp.sum((unknown[:, :, None, :] - known[:, None, :, :]) ** 2, axis=-1)
    neg_top, idx = jax.lax.top_k(-d2, 3)          # 3 smallest distances
    dist = jnp.sqrt(jnp.maximum(-neg_top, 0.0))
    return dist, idx.astype(jnp.int32)


def three_interpolate(known_feats, idx, weight):
    """known_feats: (B, C2, m), idx/weight: (B, n, 3) -> (B, C2, n)."""
    gathered = jax.vmap(lambda f, i: f[:, i])(known_feats, idx)   # (B, C2, n, 3)
    return jnp.sum(gathered * weight[:, None, :, :], axis=-1)


# ----------------------------------------------------------------------------
# Pallas kernel: SharedMLP (1x1 conv with BN-scale folded into W, shift + ReLU)
# ----------------------------------------------------------------------------
def _shared_mlp_kernel(n_layers, x_ref, *refs):
    # refs = (w0, b0, w1, b1, ..., out_ref); w_l: (C_out_l, C_in_l), b_l: (C_out_l, 1)
    out_ref = refs[-1]
    h = x_ref[0]                                   # (C_in, TN)  channels-first
    for l in range(n_layers):
        w = refs[2 * l][...]                       # BN scale already folded in
        b = refs[2 * l + 1][...]
        h = jnp.dot(w, h, preferred_element_type=jnp.float32)   # (C_out, TN)
        h = jnp.maximum(h + b, 0.0)                # folded-BN shift + ReLU
    out_ref[0] = h.astype(out_ref.dtype)


def _pick_tile_n(N, c_in, weights, vmem_budget_bytes=8 * 1024 * 1024):
    """Largest 128-multiple divisor of N whose fp32 working set fits the budget
    (input tile + all hidden activations, x2 for double buffering)."""
    channel_sum = c_in + sum(w.shape[0] for w in weights)
    for tn in (2048, 1024, 512, 256, 128):
        if N % tn == 0 and 2 * 4 * tn * channel_sum <= vmem_budget_bytes:
            return tn
    return N  # fall back to the full (untile-able) extent


def shared_mlp(x, weights, shifts, *, tile_n=None):
    """x: (B, C_in, N) channels-first.
    weights[l]: (C_out_l, C_in_l) with BN scale folded in; shifts[l]: (C_out_l, 1).
    Returns (B, C_out_last, N) -- same layout PyTorch returns."""
    B, Cin, N = x.shape
    n_layers = len(weights)
    c_out = weights[-1].shape[0]
    tn = tile_n if tile_n is not None else _pick_tile_n(N, Cin, weights)
    assert N % tn == 0, f"N={N} not divisible by tile {tn}"

    in_specs = [pl.BlockSpec((1, Cin, tn), lambda b, j: (b, 0, j))]
    args = [x]
    for w, s in zip(weights, shifts):
        in_specs.append(pl.BlockSpec(w.shape, lambda b, j: (0, 0)))
        in_specs.append(pl.BlockSpec(s.shape, lambda b, j: (0, 0)))
        args += [w, s]

    kernel = functools.partial(_shared_mlp_kernel, n_layers)
    return pl.pallas_call(
        kernel,
        out_shape=jax.ShapeDtypeStruct((B, c_out, N), jnp.float32),
        grid=(B, N // tn),
        in_specs=in_specs,
        out_specs=pl.BlockSpec((1, c_out, tn), lambda b, j: (b, 0, j)),
        compiler_params=pltpu.CompilerParams(
            dimension_semantics=("parallel", "parallel"),
            vmem_limit_bytes=32 * 1024 * 1024),   # safe on v5e/v6e/v7x
    )(*args)


# ----------------------------------------------------------------------------
# Full module forward (PointnetFPModule semantics)
# ----------------------------------------------------------------------------
def pointnet_fp_module(unknown, known, unknow_feats, known_feats, params):
    """unknown: (B,n,3), known: (B,m,3) or None,
    unknow_feats: (B,C1,n) or None, known_feats: (B,C2,m).
    Returns new_features: (B, mlp[-1], n)."""
    if known is not None:
        dist, idx = three_nn(unknown, known)
        dist_recip = 1.0 / (dist + 1e-8)
        norm = jnp.sum(dist_recip, axis=2, keepdims=True)
        weight = dist_recip / norm
        interpolated = three_interpolate(known_feats, idx, weight)   # (B,C2,n)
    else:
        interpolated = jnp.broadcast_to(
            known_feats, known_feats.shape[:2] + (unknown.shape[1],))
    if unknow_feats is not None:
        new_features = jnp.concatenate([interpolated, unknow_feats], axis=1)
    else:
        new_features = interpolated                                  # (B,C_in,n)
    return shared_mlp(new_features, params["weights"], params["shifts"])


def make_params(key, mlp_spec, bn=True):
    """1x1 Conv2d (bias=False when bn) + BatchNorm2d eval-mode (gamma=1, beta=0,
    running_mean=0, running_var=1, eps=1e-5), with the BN scale folded into the
    conv weight and the BN shift kept as a per-channel bias."""
    eps = 1e-5
    weights, shifts = [], []
    for cin, cout in zip(mlp_spec[:-1], mlp_spec[1:]):
        key, k = jax.random.split(key)
        w = jax.random.normal(k, (cout, cin), dtype=jnp.float32) * 0.1
        if bn:
            gamma = jnp.ones((cout,), jnp.float32)
            beta = jnp.zeros((cout,), jnp.float32)
            run_mean = jnp.zeros((cout,), jnp.float32)
            run_var = jnp.ones((cout,), jnp.float32)
            scale = gamma / jnp.sqrt(run_var + eps)
            shift = beta - run_mean * scale
            w = w * scale[:, None]          # fold BN scale into the conv weight
            b = shift
        else:
            b = jnp.zeros((cout,), jnp.float32)
        weights.append(w)
        shifts.append(b.reshape(cout, 1))
    return {"weights": weights, "shifts": shifts}


# ----------------------------------------------------------------------------
if __name__ == "__main__":
    key = jax.random.PRNGKey(0)
    B = 2
    n, m = 384, 16            # unknown / known point counts (n = 3 * 128 tiles)
    C1, C2 = 4, 8             # unknown-feat / known-feat channels
    mlp = [C1 + C2, 16, 32]   # SharedMLP spec (input = concat channels)

    k_u, k_k, k_uf, k_kf, k_p = jax.random.split(key, 5)
    unknown = jax.random.uniform(k_u, (B, n, 3), dtype=jnp.float32)
    known = jax.random.uniform(k_k, (B, m, 3), dtype=jnp.float32)
    unknow_feats = jax.random.normal(k_uf, (B, C1, n), dtype=jnp.float32)
    known_feats = jax.random.normal(k_kf, (B, C2, m), dtype=jnp.float32)
    params = make_params(k_p, mlp)

    out = jax.block_until_ready(
        pointnet_fp_module(unknown, known, unknow_feats, known_feats, params))
    assert out.shape == (B, mlp[-1], n)

    # Pure-jnp reference for the whole forward pass.
    dist, idx = three_nn(unknown, known)
    dist_recip = 1.0 / (dist + 1e-8)
    weight = dist_recip / jnp.sum(dist_recip, axis=2, keepdims=True)
    interp = three_interpolate(known_feats, idx, weight)
    feats = jnp.concatenate([interp, unknow_feats], axis=1)          # (B,Cin,n)
    h = feats
    for w, s in zip(params["weights"], params["shifts"]):
        h = jnp.maximum(jnp.einsum("oc,bcn->bon", w, h) + s[None], 0.0)
    assert jnp.allclose(out, h, rtol=1e-3, atol=1e-3)

    print("KERNEL_OK")
</pallas_src>

<mosaic_0001>
module attributes {stable_mosaic.version = 11 : i64} {
  func.func @_shared_mlp_kernel(%arg0: i32, %arg1: i32, %arg2: memref<1x12x128xf32, #tpu.memory_space<vmem>>, %arg3: memref<16x12xf32, #tpu.memory_space<vmem>>, %arg4: memref<16x1xf32, #tpu.memory_space<vmem>>, %arg5: memref<32x16xf32, #tpu.memory_space<vmem>>, %arg6: memref<32x1xf32, #tpu.memory_space<vmem>>, %arg7: memref<1x32x128xf32, #tpu.memory_space<vmem>>) attributes {dimension_semantics = [#tpu.dimension_semantics<parallel>, #tpu.dimension_semantics<parallel>], iteration_bounds = array<i64: 2, 3>, scalar_prefetch = 0 : i64, scratch_operands = 0 : i64, tpu.core_type = #tpu.core_type<tc>, window_params = [{transform_indices = @transform_0, window_bounds = array<i64: 1, 12, 128>}, {pipeline_mode = #tpu.pipeline_mode<synchronous>, transform_indices = @transform_1, window_bounds = array<i64: 16, 12>}, {pipeline_mode = #tpu.pipeline_mode<synchronous>, transform_indices = @transform_2, window_bounds = array<i64: 16, 1>}, {pipeline_mode = #tpu.pipeline_mode<synchronous>, transform_indices = @transform_3, window_bounds = array<i64: 32, 16>}, {pipeline_mode = #tpu.pipeline_mode<synchronous>, transform_indices = @transform_4, window_bounds = array<i64: 32, 1>}, {transform_indices = @transform_5, window_bounds = array<i64: 1, 32, 128>}]} {
    %c0 = arith.constant 0 : index
    %c0_0 = arith.constant 0 : index
    %c0_1 = arith.constant 0 : index
    %0 = vector.load %arg2[%c0, %c0_0, %c0_1] : memref<1x12x128xf32, #tpu.memory_space<vmem>>, vector<1x12x128xf32>
    %1 = vector.shape_cast %0 : vector<1x12x128xf32> to vector<12x128xf32>
    %c0_2 = arith.constant 0 : index
    %c0_3 = arith.constant 0 : index
    %2 = vector.load %arg3[%c0_2, %c0_3] : memref<16x12xf32, #tpu.memory_space<vmem>>, vector<16x12xf32>
    %c0_4 = arith.constant 0 : index
    %c0_5 = arith.constant 0 : index
    %3 = vector.load %arg4[%c0_4, %c0_5] : memref<16x1xf32, #tpu.memory_space<vmem>>, vector<16x1xf32>
    %cst = arith.constant dense<0.000000e+00> : vector<16x128xf32>
    %4 = tpu.matmul %2, %1, %cst {dimension_numbers = #tpu.dot_dimension_numbers<[1], [0], [0], [1], [0, 0, 1, 1], [], []>} : vector<16x12xf32>, vector<12x128xf32>, vector<16x128xf32> -> vector<16x128xf32>
    %5 = vector.broadcast %3 : vector<16x1xf32> to vector<16x128xf32>
    %6 = arith.addf %4, %5 : vector<16x128xf32>
    %cst_6 = arith.constant 0.000000e+00 : f32
    %7 = vector.broadcast %cst_6 : f32 to vector<16x128xf32>
    %8 = arith.maximumf %6, %7 : vector<16x128xf32>
    %c0_7 = arith.constant 0 : index
    %c0_8 = arith.constant 0 : index
    %9 = vector.load %arg5[%c0_7, %c0_8] : memref<32x16xf32, #tpu.memory_space<vmem>>, vector<32x16xf32>
    %c0_9 = arith.constant 0 : index
    %c0_10 = arith.constant 0 : index
    %10 = vector.load %arg6[%c0_9, %c0_10] : memref<32x1xf32, #tpu.memory_space<vmem>>, vector<32x1xf32>
    %cst_11 = arith.constant dense<0.000000e+00> : vector<32x128xf32>
    %11 = tpu.matmul %9, %8, %cst_11 {dimension_numbers = #tpu.dot_dimension_numbers<[1], [0], [0], [1], [0, 0, 1, 1], [], []>} : vector<32x16xf32>, vector<16x128xf32>, vector<32x128xf32> -> vector<32x128xf32>
    %12 = vector.broadcast %10 : vector<32x1xf32> to vector<32x128xf32>
    %13 = arith.addf %11, %12 : vector<32x128xf32>
    %cst_12 = arith.constant 0.000000e+00 : f32
    %14 = vector.broadcast %cst_12 : f32 to vector<32x128xf32>
    %15 = arith.maximumf %13, %14 : vector<32x128xf32>
    %c0_13 = arith.constant 0 : index
    %c0_14 = arith.constant 0 : index
    %c0_15 = arith.constant 0 : index
    %16 = vector.load %arg7[%c0_13, %c0_14, %c0_15] : memref<1x32x128xf32, #tpu.memory_space<vmem>>, vector<1x32x128xf32>
    %17 = vector.shape_cast %16 : vector<1x32x128xf32> to vector<32x128xf32>
    %18 = vector.shape_cast %15 : vector<32x128xf32> to vector<1x32x128xf32>
    tpu.vector_store %arg7[%c0_13, %c0_14, %c0_15], %18 {strides = array<i32>} : memref<1x32x128xf32, #tpu.memory_space<vmem>>, vector<1x32x128xf32>,
    return
  }
  func.func @transform_0(%arg0: i32, %arg1: i32) -> (i32, i32, i32) {
    %c0_i32 = arith.constant 0 : i32
    %c0_i32_0 = arith.constant 0 : i32
    return %arg0, %c0_i32, %arg1 : i32, i32, i32
  }
  func.func @transform_1(%arg0: i32, %arg1: i32) -> (i32, i32) {
    %c0_i32 = arith.constant 0 : i32
    %c0_i32_0 = arith.constant 0 : i32
    %c0_i32_1 = arith.constant 0 : i32
    return %c0_i32, %c0_i32_0 : i32, i32
  }
  func.func @transform_2(%arg0: i32, %arg1: i32) -> (i32, i32) {
    %c0_i32 = arith.constant 0 : i32
    %c0_i32_0 = arith.constant 0 : i32
    %c0_i32_1 = arith.constant 0 : i32
    return %c0_i32, %c0_i32_0 : i32, i32
  }
  func.func @transform_3(%arg0: i32, %arg1: i32) -> (i32, i32) {
    %c0_i32 = arith.constant 0 : i32
    %c0_i32_0 = arith.constant 0 : i32
    %c0_i32_1 = arith.constant 0 : i32
    return %c0_i32, %c0_i32_0 : i32, i32
  }
  func.func @transform_4(%arg0: i32, %arg1: i32) -> (i32, i32) {
    %c0_i32 = arith.constant 0 : i32
    %c0_i32_0 = arith.constant 0 : i32
    %c0_i32_1 = arith.constant 0 : i32
    return %c0_i32, %c0_i32_0 : i32, i32
  }
  func.func @transform_5(%arg0: i32, %arg1: i32) -> (i32, i32, i32) {
    %c0_i32 = arith.constant 0 : i32
    %c0_i32_0 = arith.constant 0 : i32
    return %arg0, %c0_i32, %arg1 : i32, i32, i32
  }
}

</mosaic_0001>

<bundles_post_ra>
// kernel: tpu_custom_call.1
= control target key start
LH: loop header
LB: loop body
LE: loop exit
PB: predicated region body
PF: predicated region fallthrough
CT: control target
= control target key end

     0   :  { %10 = vsyncpa [#allocation4], 0  ;;  %s1063_s0 = inlined_call_operand.vmem [shape: f32[2,12,384], index: 0, kind: input, shape index: {}]   ;;  %s1064_s1 = inlined_call_operand.vmem [shape: f32[16,12], index: 1, kind: input, shape index: {}]   ;;  %s1065_s2 = inlined_call_operand.vmem [shape: f32[16,1], index: 2, kind: input, shape index: {}]   ;;  %s1066_s3 = inlined_call_operand.vmem [shape: f32[32,16], index: 3, kind: input, shape index: {}]   ;;  %s1067_s4 = inlined_call_operand.vmem [shape: f32[32,1], index: 4, kind: input, shape index: {}]   ;;  %s1068_s5 = inlined_call_operand.hbm [shape: f32[2,32,384], index: 5, kind: output, shape index: {}]  }
   0x1   :  { %12 = vsyncpa [#allocation4 + $0x1], 0  ;;  %s871_s18 = smov 0   ;;  %s873_s19 = smov 0  }
   0x2   :  { %s875_s20 = smov 0   ;;  %s877_s21 = smov 0  }
   0x3   :  { %s879_s22 = smov 0   ;;  %s881_s23 = smov 0  }
   0x4   :  { %s883_s24 = smov 0   ;;  %s885_s25 = smov 0  }
   0x5 LB: > { %s616_s26 = sadd.s32 4294967295, %s834_s25   ;;  %s617_s27 = sadd.s32 4294967294, %s834_s25   ;;  %s834_s25 = sphi %s885_s25, %s18_s25   ;;  %s830_s24 = sphi %s883_s24, %s1078_s24   ;;  %s826_s23 = sphi %s881_s23, %s1077_s23   ;;  %s822_s22 = sphi %s879_s22, %s1076_s22   ;;  %s818_s21 = sphi %s877_s21, %s1075_s21   ;;  %s814_s20 = sphi %s875_s20, %s1074_s20   ;;  %s810_s19 = sphi %s873_s19, %s1073_s19   ;;  %s806_s18 = sphi %s871_s18, %s1072_s18  }
   0x6   : > { %s27_s28 = sadd.s32 1, %s826_s23  ;;  %s30_s29 = sadd.s32 1, %s830_s24 }
   0x7   : > { %p28_p0 = scmp.ge.s32.totalorder %s27_s28, 3  ;;  %p46_p1 = scmp.ne.s32.totalorder %s814_s20, %s810_s19 }
   0x8   : > { %p47_p2 = scmp.eq.s32.totalorder %s834_s25, 0  ;;  %p162_p5 = scmp.eq.s32.totalorder %s616_s26, 5 }
   0x9   : > { %s1080_s28 = smov (%p28_p0, %s27_s28), 0  ;;  %s1082_s29 = smov (!%p28_p0, %s30_s29), %s830_s24 }
   0xa   : > { %s35_s30 = ssub.s32 %s826_s23, %s1080_s28  ;;  %p923_p3 = por %p47_p2, %p46_p1 }
   0xb   : > { %p32_p4 = scmp.ge.s32.totalorder %s1082_s29, 2  ;;  %p167_p6 = scmp.ne.s32.totalorder %s810_s19, %s806_s18 }
   0xc   : > { %p168_p7 = scmp.eq.s32.totalorder %s617_s27, 5  ;;  %p931_p8 = por %p162_p5, %p46_p1 }
   0xd   : > { %s1084_s29 = smov (%p32_p4, %s1082_s29), 0  ;;  %s39_s11 = sadd.s32 1, %s814_s20 }
   0xe   : > { %p935_p9 = por %p168_p7, %p167_p6  ;;  %s34_s9 = ssub.s32 %s830_s24, %s1084_s29 }
   0xf   : > { %s36_s10 = sor.u32 %s35_s30, %s34_s9  ;;  %p619_p11 = scmp.ge.s32.totalorder %s834_s25, 6 }
  0x10   : > { %p37_p10 = scmp.eq.s32.totalorder %s36_s10, 0 }
  0x11   : > { %196 = sbr.rel (%p619_p11) target bundleno = 30 (0x1e), region = 32 }
  0x12   : > { %s943_s12 = scalar_select %p37_p10, %s814_s20, %s39_s11  }
  0x16   : > { %199 = sbr.rel (!%p923_p3) target bundleno = 30 (0x1e), region = 36  ;;  %s201_s13 = sand.u32 (%p923_p3), 1, %s814_s20  }
  0x17   : > { %s663_s14 = smul.u32 (%p923_p3), 6, %s830_s24  ;;  %s620_s15 = sshll.u32 (%p923_p3), %s201_s13, 4 }
  0x18   : > { %s203_s9 = scalar_lea.vmem (%p923_p3), [#allocation2], %s620_s15 }
  0x19   : > { %s205_s16 = sadd.s32 (%p923_p3), %s826_s23, %s663_s14 }
  0x1a   : > { %s621_s17 = sshll.u32 (%p923_p3), %s205_s16, 3 }
  0x1b   : > { %s207_s30 = scalar_lea.vmem %s1063_s0, %s621_s17 }
  0x1c   : > { %v238_v0 = vld [vmem:[%s207_s30] sm:$0xff]  ;;  %v240_v1 = vld [vmem:[%s207_s30 + $0x18] sm:$0xff] }
  0x1d   : > { %239 = vst [vmem:[%s203_s9] sm:$0xff] %v238_v0  ;;  %241 = vst [vmem:[%s203_s9 + $0x8] sm:$0xff] %v240_v1 }
  0x1e PF: > { %p622_p12 = scmp.ge.s32.totalorder %s834_s25, 1  ;;  %p246_p13 = scmp.lt.s32.totalorder %s834_s25, 7 }
  0x20   : > { %p247_p0 = pnand %p622_p12, %p246_p13 }
  0x21   : > { %s957_s6 = sand.u32 (!%p247_p0), 1, %s810_s19   ;;  %s664_s15 = smul.u32 (!%p247_p0), 12, %s822_s22 }
  0x22   : > { %250 = sbr.rel (%p247_p0) target bundleno = 465 (0x1d1), region = 74  ;;  %s623_s13 = sshll.u32 (!%p247_p0), %s957_s6, 4 }
  0x23   : > { %s255_s16 = scalar_lea.vmem (!%p247_p0), [#allocation2], %s623_s13  ;;  %s530_s17 = sadd.s32 (!%p247_p0), %s818_s21, %s664_s15 }
  0x24   : > { %s633_s30 = sshll.u32 (!%p247_p0), %s530_s17, 7  ;;  %s519_s10 = scalar_lea.sflag (!%p247_p0), [#allocation4], %s957_s6 }
  0x25   : > { %s1010_s9 = scalar_lea.hbm (!%p247_p0), %s1068_s5, %s633_s30  ;;  %s837_s13 = smov (!%p247_p0), [#allocation3]  }
  0x26   : > { %s746_s14 = sshll.u32 (!%p247_p0), %s837_s13, 4  ;;  %s747_s14 = int_to_ptr.vmem [resolvable:$false] %s746_s14 }
  0x27   : > { %v282_v2 = vld [vmem:[%s1064_s1] sm:$0xff]  ;;  %vm296_vm0 = vcmask 97280   ;;  %vm303_vm1 = vcmask 1043456   ;;  %v836_v3 = vmov 0   ;;  %v285_v4 = vld [vmem:[%s1065_s2 + $0x8] sm:$0xff]  ;;  %v390_v9 = vld [vmem:[%s1067_s4 + $0x10] sm:$0xff] }
  0x28   : > { %650 = vmatprep.mubr.msk.f32.mxu0 %vm296_vm0, %v282_v2  ;;  %740 = vset.pattern.permute.xlu0 %v836_v3  ;;  %v281_v5 = vld [vmem:[%s255_s16 + $0x8] sm:$0xf]  ;;  %v280_v6 = vld [vmem:[%s255_s16] sm:$0xff]  ;;  %vm412_vm2 = vcmask 130048   ;;  %s624_s16 = sshll.u32 %s957_s6, 5  ;;  %s748_s15 = scalar_lea.vmem %s747_s14, 1024 }
  0x29   : > { %293 = vperm.xlu0 %740, %v285_v4   ;;  %741 = vset.pattern.permute.xlu1 %v836_v3  ;;  %v284_v7 = vld [vmem:[%s1065_s2] sm:$0xff]  ;;  %v283_v8 = vld [vmem:[%s1064_s1 + $0x8] sm:$0xff]  ;;  %v391_v13 = vld [vmem:[%s1067_s4 + $0x18] sm:$0xff]  ;;  %s279_s26 = scalar_lea.vmem [#allocation3], %s624_s16 }
  0x2a   : > { %646 = vmatprep.subr.msk.mxu0 %vm303_vm1, %v281_v5  ;;  %v384_v10 = vld [vmem:[%s1066_s3] sm:$0xff]  ;;  %v389_v12 = vld [vmem:[%s1067_s4 + $0x8] sm:$0xff]  ;;  %v386_v23 = vld [vmem:[%s1066_s3 + $0x10] sm:$0xff]  ;;  %s533_s27 = sshll.u32 %s279_s26, 4  ;;  %s1005_s27 = int_to_ptr.vmem [resolvable:$true] %s533_s27 }
  0x2b   : > { %647 = vmatpush3.msk.msra.mxu0 %vm303_vm1, %v281_v5  ;;  %657 = vmatprep.mubr.msk.f32.mxu1 %vm412_vm2, %v384_v10  ;;  %v388_v11 = vld [vmem:[%s1067_s4] sm:$0xff]  ;;  %v385_v22 = vld [vmem:[%s1066_s3 + $0x8] sm:$0xff]  ;;  %v387_v24 = vld [vmem:[%s1066_s3 + $0x18] sm:$0xff]  ;;  %s742_s11 = scalar_lea.vmem %s1005_s27, 512  ;;  %p749_p4 = scmp.lt.s32.totalorder %s1005_s27, %s747_s14 }
  0x2c   : > { %648 = vmatprep.subr.mxu0 %v280_v6  ;;  %394 = vperm.xlu1 %741, %v388_v11   ;;  %p743_p1 = scmp.ne.s32.totalorder %s1005_s27, %s742_s11  ;;  %p750_p5 = scmp.lt.s32.totalorder %s748_s15, %s742_s11 }
  0x2d   : > { %288 = vperm.xlu0 %740, %v284_v7   ;;  %649 = vmatpush3.msra.mxu0 %v280_v6 }
  0x2e   : > { %651 = vmatmul.mubr.msk.f32.vlgmr.msra.gmra.mxu0 %vm296_vm0, %v283_v8  ;;  %p744_p2 = pnand %p743_p1, %p931_p8  ;;  %p751_p6 = por %p750_p5, %p749_p4 }
  0x30   : > { %399 = vperm.xlu1 %741, %v389_v12   ;;  %p745_p3 = pneg %p744_p2 }
  0x31   : > { %404 = vperm.xlu0 %740, %v390_v9  }
  0x32   : > { %p752_p7 = pnand %p751_p6, %p745_p3 }
  0x34   : > { %409 = vperm.xlu1 %741, %v391_v13  }
  0xa4   : > { %v294_v14 = vpop.permute.xlu0 %293 }
  0xa7   : > { %v395_v25 = vpop.permute.xlu1 %394 }
  0xa8   : > { %v289_v17 = vpop.permute.xlu0 %288 }
  0xab   : > { %v400_v26 = vpop.permute.xlu1 %399 }
  0xac   : > { %v405_v36 = vpop.permute.xlu0 %404 }
  0xaf   : > { %v410_v32 = vpop.permute.xlu1 %409 }
  0xee   : > { %v652_v15 = vpop.f32.mrf.mxu0 }
  0xef   : > { %v379_v16 = vadd.f32 %v652_v15, %v294_v14 }
  0xf0   : > { %v373_v18 = vpop.f32.mrf.mxu0 }
  0xf1   : > { %v383_v19 = vmax.f32 %v379_v16, 0.0  ;;  %v374_v20 = vadd.f32 %v373_v18, %v289_v17 }
  0xf3   : > { %v382_v21 = vmax.f32 %v374_v20, 0.0  ;;  %653 = vmatprep.subr.mxu1 %v383_v19 }
  0xf4   : > { %654 = vmatpush3.msra.mxu1 %v383_v19 }
  0xf5   : > { %655 = vmatprep.subr.mxu1 %v382_v21 }
  0xf6   : > { %656 = vmatpush3.msra.mxu1 %v382_v21 }
  0xf7   : > { %658 = vmatmul.mubr.msk.f32.vlgmr.msra.gmra.mxu1 %vm412_vm2, %v385_v22 }
  0xf8   : > { %660 = vmatprep.mubr.msk.f32.mxu1 %vm412_vm2, %v386_v23 }
  0xfb   : > { %661 = vmatmul.mubr.msk.f32.gmra.mxu1 %vm412_vm2, %v387_v24 }
 0x1b7   : > { %v659_v27 = vpop.f32.mrf.mxu1 }
 0x1b8   : > { %v497_v28 = vadd.f32 %v659_v27, %v400_v26 }
 0x1b9   : > { %v491_v29 = vpop.f32.mrf.mxu1 }
 0x1ba   : > { %v511_v30 = vmax.f32 %v497_v28, 0.0  ;;  %v492_v31 = vadd.f32 %v491_v29, %v395_v25 }
 0x1bb   : > { %v662_v33 = vpop.f32.mrf.mxu1 }
 0x1bc   : > { %515 = vst [vmem:[%s279_s26 + $0x8] sm:$0xff] %v511_v30  ;;  %v510_v34 = vmax.f32 %v492_v31, 0.0  ;;  %v507_v35 = vadd.f32 %v662_v33, %v410_v32 }
 0x1bd   : > { %v501_v37 = vpop.f32.mrf.mxu1 }
 0x1be   : > { %514 = vst [vmem:[%s279_s26] sm:$0xff] %v510_v34  ;;  %v513_v38 = vmax.f32 %v507_v35, 0.0  ;;  %v502_v39 = vadd.f32 %v501_v37, %v405_v36 }
 0x1c0   : > { %517 = vst [vmem:[%s279_s26 + $0x18] sm:$0xff] %v513_v38  ;;  %v512_v40 = vmax.f32 %v502_v39, 0.0 }
 0x1c2   : > { %516 = vst [vmem:[%s279_s26 + $0x10] sm:$0xff] %v512_v40 }
 0x1c3   : > { %755 = shalt.err (!%p752_p7)
}
 0x1c4   : > { %s756_s16 = scalar_lea.hbm %s1010_s9, 512  ;;  %s760_s30 = scalar_lea.hbm %s1068_s5, 3072 }
 0x1c5   : > { %p757_p10 = scmp.ne.s32.totalorder %s1010_s9, %s756_s16  ;;  %p761_p13 = scmp.lt.s32.totalorder %s1010_s9, %s1068_s5 }
 0x1c6   : > { %p762_p0 = scmp.lt.s32.totalorder %s760_s30, %s756_s16 }
 0x1c7   : > { %p758_p11 = pnand %p757_p10, %p931_p8 }
 0x1c8   : > { %p763_p1 = por %p762_p0, %p761_p13 }
 0x1c9   : > { %p759_p12 = pneg %p758_p11 }
 0x1cb   : > { %p764_p2 = pnand %p763_p1, %p759_p12 }
 0x1cd   : > { %767 = shalt.err (!%p764_p2)
}
 0x1ce   : > { %s838_s11 = smov 128   ;;  %s839_s13 = smov 384  }
 0x1cf   : > { %s840_s14 = smov 8  }
 0x1d0   : > { %665 = dma.vmem_to_hbm [thread:$0]  (%p931_p8), %s1005_s27, 512, %s1010_s9, %s519_s10, %s838_s11, %s839_s13, %s840_s14  }
 0x1d1 PF: > { %p671_p3 = scmp.ge.s32.totalorder %s834_s25, 2  ;;  %s548_s15 = sand.u32 1, %s806_s18  }
 0x1d2   : > { %s549_s16 = scalar_lea.sflag [#allocation4], %s548_s15 }
 0x1d3   : > { %p668_p4 = pnand %p671_p3, %p935_p9 }
 0x1d5   : > { %p669_p5 = pneg %p668_p4 }
 0x1d7   : > { %801 = dma.done.wait (%p669_p5), %s549_s16, 512  }
 0x1d8   : > { %803 = vsyncadd (%p669_p5), %s549_s16, 4294966784  ;;  %s18_s25 = sadd.s32 1, %s834_s25   ;;  %s1072_s18 = smov %s810_s19 }
 0x1d9   : > { %p15_p6 = scmp.ge.s32.totalorder %s18_s25, 8   ;;  %s1073_s19 = smov %s814_s20 }
 0x1da   : > { %s1074_s20 = smov %s943_s12  ;;  %s1075_s21 = smov %s826_s23 }
 0x1db   : > { %s1076_s22 = smov %s830_s24  ;;  %s1077_s23 = smov %s1080_s28 }
 0x1dc   : > { %s1078_s24 = smov %s1084_s29  ;;  %17 = sbr.rel (!%p15_p6) target bundleno = 5 (0x5), region = 118 }
 0x1e1   :  { %554 = vsyncpa [#allocation4], 1 }
 0x1e2   :  { %556 = vsyncpa [#allocation4 + $0x1], 1 }

</bundles_post_ra>
